<compile_context>
chip_gen: v7x
topology: tpu7x:2x2x1
jax: 0.10.0
libtpu: 0.0.40
codegen_flags: <defaults>
</compile_context>

<pallas_src>
import jax
import jax.numpy as jnp
from jax.experimental import pallas as pl
from jax.experimental.pallas import tpu as pltpu

BN_EPS = 1e-5
LANE = 128


def _round_up(v, m):
    return ((v + m - 1) // m) * m


def _choose_padding_and_tiles(n):
    """Pick padded node count and (tm, tk) tiles."""
    n_pad = _round_up(n, LANE)
    if n_pad >= 2048:
        # Pad large graphs to a 512-multiple so tiles never fall back to 128
        # (<= ~20% extra A traffic at this size vs a 2-3x roofline hit).
        n_pad = _round_up(n_pad, 512)
    # Row tile: as large as possible while keeping >=2 row tiles (megacore).
    tm = None
    for t in (1024, 512, 256, 128):
        if n_pad % t == 0 and n_pad // t >= 2:
            tm = t
            break
    if tm is None:
        tm = n_pad
    # Reduction tile.
    tk = None
    for t in (512, 256, 128):
        if n_pad % t == 0:
            tk = t
            break
    if tk is None:
        tk = n_pad
    return n_pad, tm, tk


def _make_sage_kernel(c_pad, tm, tk):
    """One SAGEConv (+ folded BN) + ReLU layer, tiled over (rows, reduction)."""

    def kernel(a_ref, x_ref, dinv_ref, w_ref, b_ref, out_ref, acc_ref):
        i = pl.program_id(0)
        k = pl.program_id(1)

        @pl.when(k == 0)
        def _init():
            acc_ref[...] = jnp.zeros_like(acc_ref)

        # x_ref is the FULL (n_pad, c_pad) bf16 feature matrix, VMEM-resident
        # via a constant-index BlockSpec; slice the reduction window from it
        # instead of re-streaming a (tk, c_pad) tile from HBM every step.
        k_off = pl.multiple_of(k * tk, tk)
        xk = x_ref[pl.ds(k_off, tk), :]                          # (tk, c_pad)

        # Neighbor-count partial sum on the MXU: exact 0/1 bf16 A, f32 acc.
        acc_ref[...] += jnp.dot(a_ref[...], xk,
                                preferred_element_type=jnp.float32)

        @pl.when(k == pl.num_programs(1) - 1)
        def _finalize():
            # Mean aggregation: apply the per-row 1/deg in f32 here (exact),
            # rather than baking a bf16-quantized 1/deg into A.
            agg = (acc_ref[...] * dinv_ref[...]).astype(jnp.bfloat16)
            i_off = pl.multiple_of(i * tm, tm)
            xr = x_ref[pl.ds(i_off, tm), :]                      # root features
            # lin_l(mean_agg) + lin_r(x_root), BN folded into W / bias.
            h = jnp.dot(agg, w_ref[:c_pad, :],
                        preferred_element_type=jnp.float32)
            h = h + jnp.dot(xr, w_ref[c_pad:, :],
                            preferred_element_type=jnp.float32)
            h = h + b_ref[...]
            # Padded rows get ReLU(bias) != 0 here; harmless -- their A rows
            # and root features are zero and the caller slices back to [:n].
            out_ref[...] = jnp.maximum(h, 0.0).astype(out_ref.dtype)

    return kernel


def sage_layer(a_bf16, x_pad_bf16, dinv_f32, w_cat_bf16, bias_row_f32,
               tm, tk, out_dtype):
    """One fused SAGEConv + (folded) BN + ReLU layer via a tiled pallas_call."""
    n_pad = a_bf16.shape[0]
    c_pad = x_pad_bf16.shape[1]
    h_pad = w_cat_bf16.shape[1]
    grid = (n_pad // tm, n_pad // tk)

    # VMEM working-set estimate (inputs/outputs double-buffered by pipeline).
    est = (2 * tm * tk * 2                                   # A tiles (bf16)
           + 2 * n_pad * c_pad * 2                           # resident x (bf16)
           + 2 * tm * 4                                      # 1/deg (f32)
           + 2 * 2 * c_pad * h_pad * 2                       # weights (bf16)
           + 2 * h_pad * 4                                   # bias (f32)
           + 2 * tm * h_pad * jnp.dtype(out_dtype).itemsize  # output tiles
           + tm * c_pad * 4)                                 # acc scratch (f32)
    # Cap at 48 MiB so the same tiling is safe on v7x (64 MiB/TC) as well as
    # v5e/v6e (128 MiB); floor at 32 MiB (> v5e's 16 MiB scoped default).
    vmem_limit = int(min(48 * 1024 * 1024,
                         max(32 * 1024 * 1024, est * 5 // 4)))

    return pl.pallas_call(
        _make_sage_kernel(c_pad, tm, tk),
        out_shape=jax.ShapeDtypeStruct((n_pad, h_pad), out_dtype),
        grid_spec=pltpu.PrefetchScalarGridSpec(
            num_scalar_prefetch=0,
            grid=grid,
            in_specs=[
                pl.BlockSpec((tm, tk), lambda i, k: (i, k)),            # A (0/1)
                pl.BlockSpec((n_pad, c_pad), lambda i, k: (0, 0)),      # x, resident
                pl.BlockSpec((tm, 1), lambda i, k: (i, 0)),             # 1/deg
                pl.BlockSpec((2 * c_pad, h_pad), lambda i, k: (0, 0)),  # [W_l';W_r']^T
                pl.BlockSpec((1, h_pad), lambda i, k: (0, 0)),          # folded bias
            ],
            out_specs=pl.BlockSpec((tm, h_pad), lambda i, k: (i, 0)),
            scratch_shapes=[pltpu.VMEM((tm, c_pad), jnp.float32)],
        ),
        compiler_params=pltpu.CompilerParams(
            dimension_semantics=("parallel", "arbitrary"),
            vmem_limit_bytes=vmem_limit,
        ),
    )(a_bf16, x_pad_bf16, dinv_f32, w_cat_bf16, bias_row_f32)


# ----------------------------- glue (plain JAX) -----------------------------

def build_adjacency(edge_index, num_nodes, n_pad):
    """Exact 0/1-count adjacency (bf16) + per-row f32 1/deg, zero-padded.

    TODO(synk): dense O(N^2) build; CSR + gather DMA needed for large graphs.
    """
    src, dst = edge_index[0], edge_index[1]
    adj = jnp.zeros((num_nodes, num_nodes), jnp.float32).at[dst, src].add(1.0)
    deg = adj.sum(axis=1)
    deg_inv = jnp.where(deg > 0, 1.0 / jnp.maximum(deg, 1.0), 0.0)
    a_pad = (jnp.zeros((n_pad, n_pad), jnp.float32)
             .at[:num_nodes, :num_nodes].set(adj))
    dinv_pad = (jnp.zeros((n_pad, 1), jnp.float32)
                .at[:num_nodes, 0].set(deg_inv))
    # Small-integer edge counts are exact in bf16.
    return a_pad.astype(jnp.bfloat16), dinv_pad


def fold_layer_params(layer, c_in, c_pad, h_pad):
    """Fold eval-mode BatchNorm1d into SAGEConv weights/bias; pack & pad."""
    hidden = layer["w_l"].shape[0]
    scale = layer["gamma"] * jax.lax.rsqrt(layer["rvar"] + BN_EPS)     # [H]
    wl = layer["w_l"] * scale[:, None]                                 # [H, Cin]
    wr = layer["w_r"] * scale[:, None]                                 # [H, Cin]
    bias = (layer["b_l"] - layer["rmean"]) * scale + layer["beta"]     # [H]
    w_cat = jnp.zeros((2 * c_pad, h_pad), jnp.float32)
    w_cat = w_cat.at[:c_in, :hidden].set(wl.T)                 # aggregation path
    w_cat = w_cat.at[c_pad:c_pad + c_in, :hidden].set(wr.T)    # root path
    bias_row = jnp.zeros((1, h_pad), jnp.float32).at[0, :hidden].set(bias)
    return w_cat.astype(jnp.bfloat16), bias_row


def graphsage_encoder(x, edge_index, params):
    """Forward pass of GraphSAGEEncoder (eval mode)."""
    n, c_in = x.shape
    hidden = params[0]["w_l"].shape[0]
    c_pad = _round_up(max(c_in, hidden), LANE)     # common padded channel width
    n_pad, tm, tk = _choose_padding_and_tiles(n)

    a_bf16, dinv = build_adjacency(edge_index, n, n_pad)
    h = (jnp.zeros((n_pad, c_pad), jnp.float32)
         .at[:n, :c_in].set(x)
         .astype(jnp.bfloat16))

    out = None
    layer_cins = [c_in, hidden, hidden]
    n_layers = len(params)
    for li, (layer, cin_l) in enumerate(zip(params, layer_cins)):
        w_cat, bias_row = fold_layer_params(layer, cin_l, c_pad, c_pad)
        # Intermediate layers emit bf16 directly (next-layer MXU input);
        # only the last layer writes f32.  Eval-mode dropout = identity.
        out_dtype = jnp.float32 if li == n_layers - 1 else jnp.bfloat16
        out = sage_layer(a_bf16, h, dinv, w_cat, bias_row, tm, tk, out_dtype)
        h = out
    return out[:n, :hidden]


def graphsage_reference(x, edge_index, params):
    """Pure-JAX f32 reference of the eval-mode forward (for tolerance check)."""
    n = x.shape[0]
    src, dst = edge_index[0], edge_index[1]
    adj = jnp.zeros((n, n), jnp.float32).at[dst, src].add(1.0)
    deg = adj.sum(axis=1, keepdims=True)
    a = jnp.where(deg > 0, adj / jnp.maximum(deg, 1.0), 0.0)
    h = x
    for p in params:
        agg = a @ h
        z = agg @ p["w_l"].T + p["b_l"] + h @ p["w_r"].T
        z = (z - p["rmean"]) / jnp.sqrt(p["rvar"] + BN_EPS) * p["gamma"] + p["beta"]
        h = jnp.maximum(z, 0.0)
    return h


def init_params(key, in_channels, hidden_channels):
    """Deterministic synthetic parameters for the three SAGEConv + BN layers."""
    params = []
    dims = [(in_channels, hidden_channels),
            (hidden_channels, hidden_channels),
            (hidden_channels, hidden_channels)]
    for (cin, h) in dims:
        key, k1, k2, k3, k4, k5, k6, k7 = jax.random.split(key, 8)
        scale = 1.0 / jnp.sqrt(jnp.float32(cin))
        params.append(dict(
            w_l=jax.random.normal(k1, (h, cin), jnp.float32) * scale,
            w_r=jax.random.normal(k2, (h, cin), jnp.float32) * scale,
            b_l=jax.random.normal(k3, (h,), jnp.float32) * 0.1,
            gamma=jax.random.uniform(k4, (h,), jnp.float32, 0.5, 1.5),
            beta=jax.random.normal(k5, (h,), jnp.float32) * 0.1,
            rmean=jax.random.normal(k6, (h,), jnp.float32) * 0.1,
            rvar=jax.random.uniform(k7, (h,), jnp.float32, 0.5, 1.5),
        ))
    return params


if __name__ == "__main__":
    NUM_NODES = 64
    NUM_EDGES = 256
    IN_CHANNELS = 16
    HIDDEN = 32

    key = jax.random.PRNGKey(0)
    kx, ke_src, ke_dst, kp = jax.random.split(key, 4)

    x = jax.random.normal(kx, (NUM_NODES, IN_CHANNELS), jnp.float32)
    edge_index = jnp.stack([
        jax.random.randint(ke_src, (NUM_EDGES,), 0, NUM_NODES),
        jax.random.randint(ke_dst, (NUM_EDGES,), 0, NUM_NODES),
    ], axis=0)  # [2, E]

    params = init_params(kp, IN_CHANNELS, HIDDEN)

    out = jax.jit(graphsage_encoder)(x, edge_index, params)
    out = jax.block_until_ready(out)

    assert out.shape == (NUM_NODES, HIDDEN)
    assert bool(jnp.all(jnp.isfinite(out)))
    assert bool(jnp.all(out >= 0.0))  # final ReLU

    # Tolerance-asserted pure-JAX reference (bf16 matmuls vs f32 reference).
    ref = graphsage_reference(x, edge_index, params)
    assert bool(jnp.allclose(out, ref, rtol=5e-2, atol=1e-1)), (
        "max abs err %.4f" % float(jnp.max(jnp.abs(out - ref))))

    print("KERNEL_OK")
</pallas_src>

<mosaic_0001>
module attributes {stable_mosaic.version = 11 : i64} {
  func.func private @main(%arg0: i32) attributes {dimension_semantics = [#tpu.dimension_semantics<core_parallel>], iteration_bounds = array<i64: 2>, tpu.core_type = #tpu.core_type<sc_scalar_subcore>, window_params = []} {
    return
  }
}

module attributes {stable_mosaic.version = 11 : i64} {
  func.func private @main(%arg0: i32) attributes {dimension_semantics = [#tpu.dimension_semantics<core_parallel>], iteration_bounds = array<i64: 2>, tpu.core_type = #tpu.core_type<sc_scalar_subcore>, window_params = []} {
    return
  }
}

module attributes {stable_mosaic.version = 11 : i64} {
  func.func @kernel(%arg0: i32, %arg1: i32, %arg2: memref<128x128xbf16, #tpu.memory_space<vmem>>, %arg3: memref<128x128xbf16, #tpu.memory_space<vmem>>, %arg4: memref<128x1xf32, #tpu.memory_space<vmem>>, %arg5: memref<256x128xbf16, #tpu.memory_space<vmem>>, %arg6: memref<1x128xf32, #tpu.memory_space<vmem>>, %arg7: memref<128x128xbf16, #tpu.memory_space<vmem>>, %arg8: memref<128x128xf32, #tpu.memory_space<vmem>>) attributes {dimension_semantics = [#tpu.dimension_semantics<parallel>, #tpu.dimension_semantics<arbitrary>], iteration_bounds = array<i64: 1, 1>, scalar_prefetch = 0 : i64, scratch_operands = 1 : i64, tpu.core_type = #tpu.core_type<tc>, window_params = [{transform_indices = @transform_0, window_bounds = array<i64: 128, 128>}, {pipeline_mode = #tpu.pipeline_mode<synchronous>, transform_indices = @transform_1, window_bounds = array<i64: 128, 128>}, {transform_indices = @transform_2, window_bounds = array<i64: 128, 1>}, {pipeline_mode = #tpu.pipeline_mode<synchronous>, transform_indices = @transform_3, window_bounds = array<i64: 256, 128>}, {pipeline_mode = #tpu.pipeline_mode<synchronous>, transform_indices = @transform_4, window_bounds = array<i64: 1, 128>}, {transform_indices = @transform_5, window_bounds = array<i64: 128, 128>}]} {
    %c0_i32 = arith.constant 0 : i32
    %0 = arith.cmpi eq, %arg1, %c0_i32 : i32
    %1 = arith.extui %0 : i1 to i32
    %c0_i32_0 = arith.constant 0 : i32
    %2 = arith.cmpi ne, %1, %c0_i32_0 : i32
    scf.if %2 {
      %cst_9 = arith.constant 0.000000e+00 : f32
      %15 = vector.broadcast %cst_9 : f32 to vector<128x128xf32>
      %c0_10 = arith.constant 0 : index
      %c0_11 = arith.constant 0 : index
      %16 = vector.load %arg8[%c0_10, %c0_11] : memref<128x128xf32, #tpu.memory_space<vmem>>, vector<128x128xf32>
      tpu.vector_store %arg8[%c0_10, %c0_11], %15 {strides = array<i32>} : memref<128x128xf32, #tpu.memory_space<vmem>>, vector<128x128xf32>,
    } else {
    }
    %c128_i32 = arith.constant 128 : i32
    %3 = arith.muli %arg1, %c128_i32 : i32
    %4 = tpu.assume_multiple %3, 128 : i32
    %5 = arith.index_cast %4 : i32 to index
    %c0 = arith.constant 0 : index
    %6 = vector.load %arg3[%5, %c0] : memref<128x128xbf16, #tpu.memory_space<vmem>>, vector<128x128xbf16>
    %c0_1 = arith.constant 0 : index
    %c0_2 = arith.constant 0 : index
    %7 = vector.load %arg8[%c0_1, %c0_2] : memref<128x128xf32, #tpu.memory_space<vmem>>, vector<128x128xf32>
    %c0_3 = arith.constant 0 : index
    %c0_4 = arith.constant 0 : index
    %8 = vector.load %arg2[%c0_3, %c0_4] : memref<128x128xbf16, #tpu.memory_space<vmem>>, vector<128x128xbf16>
    %cst = arith.constant dense<0.000000e+00> : vector<128x128xf32>
    %9 = tpu.matmul %8, %6, %cst {dimension_numbers = #tpu.dot_dimension_numbers<[1], [0], [0], [1], [0, 0, 1, 1], [], []>} : vector<128x128xbf16>, vector<128x128xbf16>, vector<128x128xf32> -> vector<128x128xf32>
    %10 = arith.addf %7, %9 : vector<128x128xf32>
    %c0_5 = arith.constant 0 : index
    %c0_6 = arith.constant 0 : index
    %11 = vector.load %arg8[%c0_5, %c0_6] : memref<128x128xf32, #tpu.memory_space<vmem>>, vector<128x128xf32>
    tpu.vector_store %arg8[%c0_5, %c0_6], %10 {strides = array<i32>} : memref<128x128xf32, #tpu.memory_space<vmem>>, vector<128x128xf32>,
    %c0_i32_7 = arith.constant 0 : i32
    %12 = arith.cmpi eq, %arg1, %c0_i32_7 : i32
    %13 = arith.extui %12 : i1 to i32
    %c0_i32_8 = arith.constant 0 : i32
    %14 = arith.cmpi ne, %13, %c0_i32_8 : i32
    scf.if %14 {
      %c0_9 = arith.constant 0 : index
      %c0_10 = arith.constant 0 : index
      %15 = vector.load %arg8[%c0_9, %c0_10] : memref<128x128xf32, #tpu.memory_space<vmem>>, vector<128x128xf32>
      %c0_11 = arith.constant 0 : index
      %c0_12 = arith.constant 0 : index
      %16 = vector.load %arg4[%c0_11, %c0_12] : memref<128x1xf32, #tpu.memory_space<vmem>>, vector<128x1xf32>
      %17 = vector.broadcast %16 : vector<128x1xf32> to vector<128x128xf32>
      %18 = arith.mulf %15, %17 : vector<128x128xf32>
      %19 = arith.truncf %18 : vector<128x128xf32> to vector<128x128xbf16>
      %c128_i32_13 = arith.constant 128 : i32
      %20 = arith.muli %arg0, %c128_i32_13 : i32
      %21 = tpu.assume_multiple %20, 128 : i32
      %22 = arith.index_cast %21 : i32 to index
      %c0_14 = arith.constant 0 : index
      %23 = vector.load %arg3[%22, %c0_14] : memref<128x128xbf16, #tpu.memory_space<vmem>>, vector<128x128xbf16>
      %c0_15 = arith.constant 0 : index
      %c0_16 = arith.constant 0 : index
      %24 = vector.load %arg5[%c0_15, %c0_16] : memref<256x128xbf16, #tpu.memory_space<vmem>>, vector<128x128xbf16>
      %cst_17 = arith.constant dense<0.000000e+00> : vector<128x128xf32>
      %25 = tpu.matmul %19, %24, %cst_17 {dimension_numbers = #tpu.dot_dimension_numbers<[1], [0], [0], [1], [0, 0, 1, 1], [], []>} : vector<128x128xbf16>, vector<128x128xbf16>, vector<128x128xf32> -> vector<128x128xf32>
      %c128 = arith.constant 128 : index
      %c0_18 = arith.constant 0 : index
      %26 = vector.load %arg5[%c128, %c0_18] : memref<256x128xbf16, #tpu.memory_space<vmem>>, vector<128x128xbf16>
      %cst_19 = arith.constant dense<0.000000e+00> : vector<128x128xf32>
      %27 = tpu.matmul %23, %26, %cst_19 {dimension_numbers = #tpu.dot_dimension_numbers<[1], [0], [0], [1], [0, 0, 1, 1], [], []>} : vector<128x128xbf16>, vector<128x128xbf16>, vector<128x128xf32> -> vector<128x128xf32>
      %28 = arith.addf %25, %27 : vector<128x128xf32>
      %c0_20 = arith.constant 0 : index
      %c0_21 = arith.constant 0 : index
      %29 = vector.load %arg6[%c0_20, %c0_21] : memref<1x128xf32, #tpu.memory_space<vmem>>, vector<1x128xf32>
      %30 = vector.broadcast %29 : vector<1x128xf32> to vector<128x128xf32>
      %31 = arith.addf %28, %30 : vector<128x128xf32>
      %cst_22 = arith.constant 0.000000e+00 : f32
      %32 = vector.broadcast %cst_22 : f32 to vector<128x128xf32>
      %33 = arith.maximumf %31, %32 : vector<128x128xf32>
      %34 = arith.truncf %33 : vector<128x128xf32> to vector<128x128xbf16>
      %c0_23 = arith.constant 0 : index
      %c0_24 = arith.constant 0 : index
      %35 = vector.load %arg7[%c0_23, %c0_24] : memref<128x128xbf16, #tpu.memory_space<vmem>>, vector<128x128xbf16>
      tpu.vector_store %arg7[%c0_23, %c0_24], %34 {strides = array<i32>} : memref<128x128xbf16, #tpu.memory_space<vmem>>, vector<128x128xbf16>,
    } else {
    }
    return
  }
  func.func @transform_0(%arg0: i32, %arg1: i32) -> (i32, i32) {
    %c0_i32 = arith.constant 0 : i32
    return %arg0, %arg1 : i32, i32
  }
  func.func @transform_1(%arg0: i32, %arg1: i32) -> (i32, i32) {
    %c0_i32 = arith.constant 0 : i32
    %c0_i32_0 = arith.constant 0 : i32
    %c0_i32_1 = arith.constant 0 : i32
    return %c0_i32, %c0_i32_0 : i32, i32
  }
  func.func @transform_2(%arg0: i32, %arg1: i32) -> (i32, i32) {
    %c0_i32 = arith.constant 0 : i32
    %c0_i32_0 = arith.constant 0 : i32
    return %arg0, %c0_i32 : i32, i32
  }
  func.func @transform_3(%arg0: i32, %arg1: i32) -> (i32, i32) {
    %c0_i32 = arith.constant 0 : i32
    %c0_i32_0 = arith.constant 0 : i32
    %c0_i32_1 = arith.constant 0 : i32
    return %c0_i32, %c0_i32_0 : i32, i32
  }
  func.func @transform_4(%arg0: i32, %arg1: i32) -> (i32, i32) {
    %c0_i32 = arith.constant 0 : i32
    %c0_i32_0 = arith.constant 0 : i32
    %c0_i32_1 = arith.constant 0 : i32
    return %c0_i32, %c0_i32_0 : i32, i32
  }
  func.func @transform_5(%arg0: i32, %arg1: i32) -> (i32, i32) {
    %c0_i32 = arith.constant 0 : i32
    %c0_i32_0 = arith.constant 0 : i32
    return %arg0, %c0_i32 : i32, i32
  }
}

module attributes {stable_mosaic.version = 11 : i64} {
  func.func @kernel(%arg0: i32, %arg1: i32, %arg2: memref<128x128xbf16, #tpu.memory_space<vmem>>, %arg3: memref<128x128xbf16, #tpu.memory_space<vmem>>, %arg4: memref<128x1xf32, #tpu.memory_space<vmem>>, %arg5: memref<256x128xbf16, #tpu.memory_space<vmem>>, %arg6: memref<1x128xf32, #tpu.memory_space<vmem>>, %arg7: memref<128x128xf32, #tpu.memory_space<vmem>>, %arg8: memref<128x128xf32, #tpu.memory_space<vmem>>) attributes {dimension_semantics = [#tpu.dimension_semantics<parallel>, #tpu.dimension_semantics<arbitrary>], iteration_bounds = array<i64: 1, 1>, scalar_prefetch = 0 : i64, scratch_operands = 1 : i64, tpu.core_type = #tpu.core_type<tc>, window_params = [{transform_indices = @transform_0, window_bounds = array<i64: 128, 128>}, {pipeline_mode = #tpu.pipeline_mode<synchronous>, transform_indices = @transform_1, window_bounds = array<i64: 128, 128>}, {transform_indices = @transform_2, window_bounds = array<i64: 128, 1>}, {pipeline_mode = #tpu.pipeline_mode<synchronous>, transform_indices = @transform_3, window_bounds = array<i64: 256, 128>}, {pipeline_mode = #tpu.pipeline_mode<synchronous>, transform_indices = @transform_4, window_bounds = array<i64: 1, 128>}, {transform_indices = @transform_5, window_bounds = array<i64: 128, 128>}]} {
    %c0_i32 = arith.constant 0 : i32
    %0 = arith.cmpi eq, %arg1, %c0_i32 : i32
    %1 = arith.extui %0 : i1 to i32
    %c0_i32_0 = arith.constant 0 : i32
    %2 = arith.cmpi ne, %1, %c0_i32_0 : i32
    scf.if %2 {
      %cst_9 = arith.constant 0.000000e+00 : f32
      %15 = vector.broadcast %cst_9 : f32 to vector<128x128xf32>
      %c0_10 = arith.constant 0 : index
      %c0_11 = arith.constant 0 : index
      %16 = vector.load %arg8[%c0_10, %c0_11] : memref<128x128xf32, #tpu.memory_space<vmem>>, vector<128x128xf32>
      tpu.vector_store %arg8[%c0_10, %c0_11], %15 {strides = array<i32>} : memref<128x128xf32, #tpu.memory_space<vmem>>, vector<128x128xf32>,
    } else {
    }
    %c128_i32 = arith.constant 128 : i32
    %3 = arith.muli %arg1, %c128_i32 : i32
    %4 = tpu.assume_multiple %3, 128 : i32
    %5 = arith.index_cast %4 : i32 to index
    %c0 = arith.constant 0 : index
    %6 = vector.load %arg3[%5, %c0] : memref<128x128xbf16, #tpu.memory_space<vmem>>, vector<128x128xbf16>
    %c0_1 = arith.constant 0 : index
    %c0_2 = arith.constant 0 : index
    %7 = vector.load %arg8[%c0_1, %c0_2] : memref<128x128xf32, #tpu.memory_space<vmem>>, vector<128x128xf32>
    %c0_3 = arith.constant 0 : index
    %c0_4 = arith.constant 0 : index
    %8 = vector.load %arg2[%c0_3, %c0_4] : memref<128x128xbf16, #tpu.memory_space<vmem>>, vector<128x128xbf16>
    %cst = arith.constant dense<0.000000e+00> : vector<128x128xf32>
    %9 = tpu.matmul %8, %6, %cst {dimension_numbers = #tpu.dot_dimension_numbers<[1], [0], [0], [1], [0, 0, 1, 1], [], []>} : vector<128x128xbf16>, vector<128x128xbf16>, vector<128x128xf32> -> vector<128x128xf32>
    %10 = arith.addf %7, %9 : vector<128x128xf32>
    %c0_5 = arith.constant 0 : index
    %c0_6 = arith.constant 0 : index
    %11 = vector.load %arg8[%c0_5, %c0_6] : memref<128x128xf32, #tpu.memory_space<vmem>>, vector<128x128xf32>
    tpu.vector_store %arg8[%c0_5, %c0_6], %10 {strides = array<i32>} : memref<128x128xf32, #tpu.memory_space<vmem>>, vector<128x128xf32>,
    %c0_i32_7 = arith.constant 0 : i32
    %12 = arith.cmpi eq, %arg1, %c0_i32_7 : i32
    %13 = arith.extui %12 : i1 to i32
    %c0_i32_8 = arith.constant 0 : i32
    %14 = arith.cmpi ne, %13, %c0_i32_8 : i32
    scf.if %14 {
      %c0_9 = arith.constant 0 : index
      %c0_10 = arith.constant 0 : index
      %15 = vector.load %arg8[%c0_9, %c0_10] : memref<128x128xf32, #tpu.memory_space<vmem>>, vector<128x128xf32>
      %c0_11 = arith.constant 0 : index
      %c0_12 = arith.constant 0 : index
      %16 = vector.load %arg4[%c0_11, %c0_12] : memref<128x1xf32, #tpu.memory_space<vmem>>, vector<128x1xf32>
      %17 = vector.broadcast %16 : vector<128x1xf32> to vector<128x128xf32>
      %18 = arith.mulf %15, %17 : vector<128x128xf32>
      %19 = arith.truncf %18 : vector<128x128xf32> to vector<128x128xbf16>
      %c128_i32_13 = arith.constant 128 : i32
      %20 = arith.muli %arg0, %c128_i32_13 : i32
      %21 = tpu.assume_multiple %20, 128 : i32
      %22 = arith.index_cast %21 : i32 to index
      %c0_14 = arith.constant 0 : index
      %23 = vector.load %arg3[%22, %c0_14] : memref<128x128xbf16, #tpu.memory_space<vmem>>, vector<128x128xbf16>
      %c0_15 = arith.constant 0 : index
      %c0_16 = arith.constant 0 : index
      %24 = vector.load %arg5[%c0_15, %c0_16] : memref<256x128xbf16, #tpu.memory_space<vmem>>, vector<128x128xbf16>
      %cst_17 = arith.constant dense<0.000000e+00> : vector<128x128xf32>
      %25 = tpu.matmul %19, %24, %cst_17 {dimension_numbers = #tpu.dot_dimension_numbers<[1], [0], [0], [1], [0, 0, 1, 1], [], []>} : vector<128x128xbf16>, vector<128x128xbf16>, vector<128x128xf32> -> vector<128x128xf32>
      %c128 = arith.constant 128 : index
      %c0_18 = arith.constant 0 : index
      %26 = vector.load %arg5[%c128, %c0_18] : memref<256x128xbf16, #tpu.memory_space<vmem>>, vector<128x128xbf16>
      %cst_19 = arith.constant dense<0.000000e+00> : vector<128x128xf32>
      %27 = tpu.matmul %23, %26, %cst_19 {dimension_numbers = #tpu.dot_dimension_numbers<[1], [0], [0], [1], [0, 0, 1, 1], [], []>} : vector<128x128xbf16>, vector<128x128xbf16>, vector<128x128xf32> -> vector<128x128xf32>
      %28 = arith.addf %25, %27 : vector<128x128xf32>
      %c0_20 = arith.constant 0 : index
      %c0_21 = arith.constant 0 : index
      %29 = vector.load %arg6[%c0_20, %c0_21] : memref<1x128xf32, #tpu.memory_space<vmem>>, vector<1x128xf32>
      %30 = vector.broadcast %29 : vector<1x128xf32> to vector<128x128xf32>
      %31 = arith.addf %28, %30 : vector<128x128xf32>
      %cst_22 = arith.constant 0.000000e+00 : f32
      %32 = vector.broadcast %cst_22 : f32 to vector<128x128xf32>
      %33 = arith.maximumf %31, %32 : vector<128x128xf32>
      %c0_23 = arith.constant 0 : index
      %c0_24 = arith.constant 0 : index
      %34 = vector.load %arg7[%c0_23, %c0_24] : memref<128x128xf32, #tpu.memory_space<vmem>>, vector<128x128xf32>
      tpu.vector_store %arg7[%c0_23, %c0_24], %33 {strides = array<i32>} : memref<128x128xf32, #tpu.memory_space<vmem>>, vector<128x128xf32>,
    } else {
    }
    return
  }
  func.func @transform_0(%arg0: i32, %arg1: i32) -> (i32, i32) {
    %c0_i32 = arith.constant 0 : i32
    return %arg0, %arg1 : i32, i32
  }
  func.func @transform_1(%arg0: i32, %arg1: i32) -> (i32, i32) {
    %c0_i32 = arith.constant 0 : i32
    %c0_i32_0 = arith.constant 0 : i32
    %c0_i32_1 = arith.constant 0 : i32
    return %c0_i32, %c0_i32_0 : i32, i32
  }
  func.func @transform_2(%arg0: i32, %arg1: i32) -> (i32, i32) {
    %c0_i32 = arith.constant 0 : i32
    %c0_i32_0 = arith.constant 0 : i32
    return %arg0, %c0_i32 : i32, i32
  }
  func.func @transform_3(%arg0: i32, %arg1: i32) -> (i32, i32) {
    %c0_i32 = arith.constant 0 : i32
    %c0_i32_0 = arith.constant 0 : i32
    %c0_i32_1 = arith.constant 0 : i32
    return %c0_i32, %c0_i32_0 : i32, i32
  }
  func.func @transform_4(%arg0: i32, %arg1: i32) -> (i32, i32) {
    %c0_i32 = arith.constant 0 : i32
    %c0_i32_0 = arith.constant 0 : i32
    %c0_i32_1 = arith.constant 0 : i32
    return %c0_i32, %c0_i32_0 : i32, i32
  }
  func.func @transform_5(%arg0: i32, %arg1: i32) -> (i32, i32) {
    %c0_i32 = arith.constant 0 : i32
    %c0_i32_0 = arith.constant 0 : i32
    return %arg0, %c0_i32 : i32, i32
  }
}

</mosaic_0001>

<bundles_post_ra>
// kernel: graphsage_encoder.3
= control target key start
LH: loop header
LB: loop body
LE: loop exit
PB: predicated region body
PF: predicated region fallthrough
CT: control target
= control target key end

     0   :  { %v1315_v1 = vmov 0   ;;  %s1565_s1 = inlined_call_operand.vmem [shape: bf16[128,128], index: 1, kind: input, shape index: {}]   ;;  %s1566_s0 = inlined_call_operand.vmem [shape: bf16[128,128], index: 0, kind: input, shape index: {}]   ;;  %s1567_s2 = inlined_call_operand.vmem [shape: f32[128,1], index: 2, kind: input, shape index: {}]   ;;  %s1568_s3 = inlined_call_operand.vmem [shape: bf16[256,128], index: 3, kind: input, shape index: {}]   ;;  %s1569_s4 = inlined_call_operand.vmem [shape: f32[1,128], index: 4, kind: input, shape index: {}]   ;;  %s1570_s5 = inlined_call_operand.vmem [shape: bf16[128,128], index: 5, kind: output, shape index: {}]  }
   0x1   :  { %v1275_v0 = vld [vmem:[%s1565_s1] sm:$0xff]   ;;  %1274 = vset.pattern.permute.xlu1 %v1315_v1  ;;  %1273 = vset.pattern.permute.xlu0 %v1315_v1  ;;  %v1276_v2 = vld [vmem:[%s1565_s1 + $0x8] sm:$0xff]   ;;  %v1277_v3 = vld [vmem:[%s1565_s1 + $0x10] sm:$0xff]  }
   0x2   :  { %1144 = vmatprep.subr.bf16.mxu0 %v1275_v0  ;;  %v1278_v4 = vld [vmem:[%s1565_s1 + $0x18] sm:$0xff]   ;;  %v1283_v5 = vld [vmem:[%s1566_s0] sm:$0xff]   ;;  %v1280_v7 = vld [vmem:[%s1565_s1 + $0x28] sm:$0xff]  }
   0x3   :  { %1145 = vmatpush3.bf16.msra.mxu0 %v1275_v0  ;;  %1160 = vmatprep.mubr.bf16.mxu0 %v1283_v5  ;;  %v1279_v6 = vld [vmem:[%s1565_s1 + $0x20] sm:$0xff]   ;;  %v340_v8 = vld [vmem:[%s1567_s2 + $0x10] sm:$0xff]  ;;  %v341_v10 = vld [vmem:[%s1567_s2 + $0x18] sm:$0xff] }
   0x4   :  { %1146 = vmatprep.subr.bf16.mxu0 %v1276_v2  ;;  %v338_v9 = vld [vmem:[%s1567_s2] sm:$0xff]  ;;  %366 = vperm.xlu1 %1274, %v340_v8   ;;  %v339_v11 = vld [vmem:[%s1567_s2 + $0x8] sm:$0xff]  ;;  %v1281_v12 = vld [vmem:[%s1565_s1 + $0x30] sm:$0xff]  }
   0x5   :  { %356 = vperm.xlu0 %1273, %v338_v9   ;;  %v347_v13 = vld [vmem:[%s1567_s2 + $0x48] sm:$0xff]  ;;  %v346_v14 = vld [vmem:[%s1567_s2 + $0x40] sm:$0xff]  ;;  %v1282_v17 = vld [vmem:[%s1565_s1 + $0x38] sm:$0xff]  }
   0x6   :  { %v1291_v15 = vld [vmem:[%s1568_s3 + $0x40] sm:$0xff]   ;;  %v1292_v16 = vld [vmem:[%s1568_s3 + $0x48] sm:$0xff]   ;;  %v349_v18 = vld [vmem:[%s1567_s2 + $0x58] sm:$0xff] }
   0x7   :  { %1147 = vmatpush3.bf16.msra.mxu0 %v1276_v2  ;;  %1176 = vmatprep.subr.bf16.mxu1 %v1291_v15  ;;  %v348_v19 = vld [vmem:[%s1567_s2 + $0x50] sm:$0xff]  ;;  %v1284_v21 = vld [vmem:[%s1566_s0 + $0x8] sm:$0xff]   ;;  %v1412_v22 = vld [vmem:[%s1568_s3] sm:$0xff]  }
   0x8   :  { %1148 = vmatprep.subr.bf16.mxu0 %v1277_v3  ;;  %371 = vperm.xlu1 %1274, %v341_v10   ;;  %v1293_v20 = vld [vmem:[%s1568_s3 + $0x50] sm:$0xff]   ;;  %v343_v24 = vld [vmem:[%s1567_s2 + $0x28] sm:$0xff]  ;;  %v342_v25 = vld [vmem:[%s1567_s2 + $0x20] sm:$0xff] }
   0x9   :  { %361 = vperm.xlu0 %1273, %v339_v11   ;;  %1177 = vmatpush3.bf16.msra.mxu1 %v1291_v15  ;;  %v1285_v23 = vld [vmem:[%s1566_s0 + $0x10] sm:$0xff]   ;;  %v1294_v26 = vld [vmem:[%s1568_s3 + $0x58] sm:$0xff]   ;;  %v1302_v29 = vld [vmem:[%s1565_s1] sm:$0xff]  }
   0xa   :  { %1178 = vmatprep.subr.bf16.mxu1 %v1292_v16  ;;  %v345_v27 = vld [vmem:[%s1567_s2 + $0x38] sm:$0xff]  ;;  %v344_v28 = vld [vmem:[%s1567_s2 + $0x30] sm:$0xff]  ;;  %v1298_v30 = vld [vmem:[%s1568_s3 + $0x8] sm:$0xff]   ;;  %1192 = vmatprep.mubr.bf16.mxu1 %v1302_v29 }
   0xb   :  { %1149 = vmatpush3.bf16.msra.mxu0 %v1277_v3  ;;  %v1295_v31 = vld [vmem:[%s1568_s3 + $0x60] sm:$0xff]   ;;  %v1286_v32 = vld [vmem:[%s1566_s0 + $0x18] sm:$0xff]   ;;  %v351_v33 = vld [vmem:[%s1567_s2 + $0x68] sm:$0xff] }
   0xc   :  { %1150 = vmatprep.subr.bf16.mxu0 %v1278_v4  ;;  %401 = vperm.xlu1 %1274, %v347_v13   ;;  %v350_v34 = vld [vmem:[%s1567_s2 + $0x60] sm:$0xff]  ;;  %v1297_v36 = vld [vmem:[%s1568_s3 + $0x68] sm:$0xff]   ;;  %v353_v37 = vld [vmem:[%s1567_s2 + $0x78] sm:$0xff] }
   0xd   :  { %396 = vperm.xlu0 %1273, %v346_v14   ;;  %1179 = vmatpush3.bf16.msra.mxu1 %v1292_v16  ;;  %v1287_v35 = vld [vmem:[%s1566_s0 + $0x20] sm:$0xff]   ;;  %v352_v38 = vld [vmem:[%s1567_s2 + $0x70] sm:$0xff]  ;;  %v1303_v41 = vld [vmem:[%s1568_s3 + $0x18] sm:$0xff]  }
   0xe   :  { %1180 = vmatprep.subr.bf16.mxu1 %v1293_v20  ;;  %v1300_v39 = vld [vmem:[%s1568_s3 + $0x10] sm:$0xff]   ;;  %v1288_v42 = vld [vmem:[%s1566_s0 + $0x28] sm:$0xff]   ;;  %v1301_v44 = vld [vmem:[%s1568_s3 + $0x78] sm:$0xff]  }
   0xf   :  { %1151 = vmatpush3.bf16.msra.mxu0 %v1278_v4  ;;  %v1299_v40 = vld [vmem:[%s1568_s3 + $0x70] sm:$0xff]   ;;  %v1305_v45 = vld [vmem:[%s1568_s3 + $0x20] sm:$0xff]   ;;  %v1304_v46 = vld [vmem:[%s1565_s1 + $0x8] sm:$0xff]  }
  0x10   :  { %1152 = vmatprep.subr.bf16.mxu0 %v1279_v6  ;;  %411 = vperm.xlu1 %1274, %v349_v18   ;;  %v1289_v43 = vld [vmem:[%s1566_s0 + $0x30] sm:$0xff]   ;;  %v1307_v47 = vld [vmem:[%s1568_s3 + $0x28] sm:$0xff]   ;;  %v1290_v48 = vld [vmem:[%s1566_s0 + $0x38] sm:$0xff]  }
  0x11   :  { %406 = vperm.xlu0 %1273, %v348_v19   ;;  %1181 = vmatpush3.bf16.msra.mxu1 %v1293_v20  ;;  %v1306_v49 = vld [vmem:[%s1565_s1 + $0x10] sm:$0xff]   ;;  %v1308_v50 = vld [vmem:[%s1565_s1 + $0x18] sm:$0xff]   ;;  %v1311_v53 = vld [vmem:[%s1565_s1 + $0x20] sm:$0xff]  }
  0x12   :  { %1182 = vmatprep.subr.bf16.mxu1 %v1294_v26  ;;  %v1309_v51 = vld [vmem:[%s1568_s3 + $0x30] sm:$0xff]   ;;  %v1310_v52 = vld [vmem:[%s1568_s3 + $0x38] sm:$0xff]   ;;  %v1312_v54 = vld [vmem:[%s1565_s1 + $0x28] sm:$0xff]  }
  0x13   :  { %1153 = vmatpush3.bf16.msra.mxu0 %v1279_v6  ;;  %v1313_v55 = vld [vmem:[%s1565_s1 + $0x30] sm:$0xff]   ;;  %v1314_v56 = vld [vmem:[%s1565_s1 + $0x38] sm:$0xff]  }
  0x14   :  { %1154 = vmatprep.subr.bf16.mxu0 %v1280_v7  ;;  %381 = vperm.xlu1 %1274, %v343_v24  }
  0x15   :  { %376 = vperm.xlu0 %1273, %v342_v25   ;;  %1183 = vmatpush3.bf16.msra.mxu1 %v1294_v26 }
  0x16   :  { %1184 = vmatprep.subr.bf16.mxu1 %v1295_v31 }
  0x17   :  { %1155 = vmatpush3.bf16.msra.mxu0 %v1280_v7 }
  0x18   :  { %1156 = vmatprep.subr.bf16.mxu0 %v1281_v12  ;;  %391 = vperm.xlu1 %1274, %v345_v27  }
  0x19   :  { %386 = vperm.xlu0 %1273, %v344_v28   ;;  %1185 = vmatpush3.bf16.msra.mxu1 %v1295_v31 }
  0x1a   :  { %1186 = vmatprep.subr.bf16.mxu1 %v1297_v36 }
  0x1b   :  { %1157 = vmatpush3.bf16.msra.mxu0 %v1281_v12 }
  0x1c   :  { %1158 = vmatprep.subr.bf16.mxu0 %v1282_v17  ;;  %421 = vperm.xlu1 %1274, %v351_v33  }
  0x1d   :  { %416 = vperm.xlu0 %1273, %v350_v34   ;;  %1187 = vmatpush3.bf16.msra.mxu1 %v1297_v36 }
  0x1e   :  { %1188 = vmatprep.subr.bf16.mxu1 %v1299_v40 }
  0x1f   :  { %1159 = vmatpush3.bf16.msra.mxu0 %v1282_v17 }
  0x20   :  { %1208 = vmatprep.subr.bf16.mxu0 %v1412_v22  ;;  %431 = vperm.xlu1 %1274, %v353_v37  }
  0x21   :  { %426 = vperm.xlu0 %1273, %v352_v38   ;;  %1189 = vmatpush3.bf16.msra.mxu1 %v1299_v40 }
  0x22   :  { %1161 = vmatmul.mubr.bf16.vlgmr.msra.gmra.mrb[0].mxu0 %v1284_v21  ;;  %1190 = vmatprep.subr.bf16.mxu1 %v1301_v44 }
  0x23   :  { %1164 = vmatprep.mubr.bf16.mxu0 %v1285_v23  ;;  %1209 = vmatpush3.bf16.msra.mxu0 %v1412_v22 }
  0x24   :  { %1210 = vmatprep.subr.bf16.mxu0 %v1298_v30 }
  0x25   :  { %1191 = vmatpush3.bf16.msra.mxu1 %v1301_v44 }
  0x26   :  { %1240 = vmatprep.subr.bf16.mxu1 %v1412_v22 }
  0x27   :  { %1211 = vmatpush3.bf16.msra.mxu0 %v1298_v30 }
  0x28   :  { %1212 = vmatprep.subr.bf16.mxu0 %v1300_v39  ;;  %1193 = vmatmul.mubr.bf16.vlgmr.msra.gmra.mrb[0].mxu1 %v1304_v46 }
  0x29   :  { %1248 = vmatpush3.bf16.msra.mxu1 %v1412_v22  ;;  %1196 = vmatprep.mubr.bf16.mxu1 %v1306_v49 }
  0x2a   :  { %1165 = vmatmul.mubr.bf16.gmra.mrb[4].mxu0 %v1286_v32  ;;  %1241 = vmatprep.subr.bf16.mxu1 %v1298_v30 }
  0x2b   :  { %1168 = vmatprep.mubr.bf16.mxu0 %v1287_v35  ;;  %1213 = vmatpush3.bf16.msra.mxu0 %v1300_v39 }
  0x2c   :  { %1214 = vmatprep.subr.bf16.mxu0 %v1303_v41 }
  0x2d   :  { %1249 = vmatpush3.bf16.msra.mxu1 %v1298_v30 }
  0x2e   :  { %1242 = vmatprep.subr.bf16.mxu1 %v1300_v39 }
  0x2f   :  { %1215 = vmatpush3.bf16.msra.mxu0 %v1303_v41 }
  0x30   :  { %1216 = vmatprep.subr.bf16.mxu0 %v1305_v45  ;;  %1197 = vmatmul.mubr.bf16.gmra.mrb[4].mxu1 %v1308_v50 }
  0x31   :  { %1250 = vmatpush3.bf16.msra.mxu1 %v1300_v39  ;;  %1200 = vmatprep.mubr.bf16.mxu1 %v1311_v53 }
  0x32   :  { %1169 = vmatmul.mubr.bf16.gmra.mrb[8].mxu0 %v1288_v42  ;;  %1243 = vmatprep.subr.bf16.mxu1 %v1303_v41 }
  0x33   :  { %1172 = vmatprep.mubr.bf16.mxu0 %v1289_v43  ;;  %1217 = vmatpush3.bf16.msra.mxu0 %v1305_v45 }
  0x34   :  { %1218 = vmatprep.subr.bf16.mxu0 %v1307_v47 }
  0x35   :  { %1251 = vmatpush3.bf16.msra.mxu1 %v1303_v41 }
  0x36   :  { %1244 = vmatprep.subr.bf16.mxu1 %v1305_v45 }
  0x37   :  { %1219 = vmatpush3.bf16.msra.mxu0 %v1307_v47 }
  0x38   :  { %1220 = vmatprep.subr.bf16.mxu0 %v1309_v51  ;;  %1201 = vmatmul.mubr.bf16.gmra.mrb[8].mxu1 %v1312_v54 }
  0x39   :  { %1252 = vmatpush3.bf16.msra.mxu1 %v1305_v45  ;;  %1204 = vmatprep.mubr.bf16.mxu1 %v1313_v55 }
  0x3a   :  { %1173 = vmatmul.mubr.bf16.gmra.mrb[12].mxu0 %v1290_v48  ;;  %1245 = vmatprep.subr.bf16.mxu1 %v1307_v47 }
  0x3b   :  { %1221 = vmatpush3.bf16.msra.mxu0 %v1309_v51 }
  0x3c   :  { %1222 = vmatprep.subr.bf16.mxu0 %v1310_v52 }
  0x3d   :  { %1253 = vmatpush3.bf16.msra.mxu1 %v1307_v47 }
  0x3e   :  { %1246 = vmatprep.subr.bf16.mxu1 %v1309_v51 }
  0x3f   :  { %1223 = vmatpush3.bf16.msra.mxu0 %v1310_v52 }
  0x40   :  { %1205 = vmatmul.mubr.bf16.gmra.mrb[12].mxu1 %v1314_v56 }
  0x41   :  { %1254 = vmatpush3.bf16.msra.mxu1 %v1309_v51 }
  0x42   :  { %1247 = vmatprep.subr.bf16.mxu1 %v1310_v52 }
  0x45   :  { %1255 = vmatpush3.bf16.msra.mxu1 %v1310_v52 }
  0x83   :  { %v367_v57 = vpop.permute.xlu1 %366 }
  0x84   :  { %v357_v58 = vpop.permute.xlu0 %356 }
  0x87   :  { %v372_v59 = vpop.permute.xlu1 %371 }
  0x88   :  { %v362_v60 = vpop.permute.xlu0 %361 }
  0x8b   :  { %v402_v61 = vpop.permute.xlu1 %401 }
  0x8c   :  { %v397_v62 = vpop.permute.xlu0 %396 }
  0x8f   :  { %v412_v63 = vpop.permute.xlu1 %411 }
  0x90   :  { %v407_v0 = vpop.permute.xlu0 %406 }
  0x93   :  { %v382_v4 = vpop.permute.xlu1 %381 }
  0x94   :  { %v377_v8 = vpop.permute.xlu0 %376 }
  0x97   :  { %v392_v14 = vpop.permute.xlu1 %391 }
  0x98   :  { %v387_v16 = vpop.permute.xlu0 %386 }
  0x9b   :  { %v422_v25 = vpop.permute.xlu1 %421 }
  0x9c   :  { %v417_v27 = vpop.permute.xlu0 %416 }
  0x9f   :  { %v432_v36 = vpop.permute.xlu1 %431 }
  0xa0   :  { %v427_v38 = vpop.permute.xlu0 %426 }
  0xf5   :  { %v1162_v1 = vpop.f32.mrb[0].mxu0 }
  0xf6   :  { %v224_v2 = vpop.f32.mrb[1].mxu0  ;;  %v436_v5 = vmul.f32 %v1162_v1, %v367_v57 }
  0xf7   :  { %v1163_v3 = vpop.f32.mrb[2].mxu0  ;;  %v434_v9 = vmul.f32 %v357_v58, %v224_v2  ;;  %v1523_v58 = vld [vmem:[%s1569_s4] ss:$0 sm:$0xff] }
  0xf8   :  { %v437_v6 = vmul.f32 %v1163_v3, %v372_v59  ;;  %v227_v7 = vpop.f32.mrb[3].mxu0 }
  0xf9   :  { %v435_v10 = vmul.f32 %v362_v60, %v227_v7 }
  0xfa   :  { %v451_v11 = vpack.c.bf16 %v437_v6, %v436_v5 }
  0xfb   :  { %v450_v12 = vpack.c.bf16 %v435_v10, %v434_v9  ;;  %v1194_v39 = vpop.f32.mrb[0].mxu1 }
  0xfc   :  { %v641_v41 = vpop.f32.mrb[1].mxu1 }
  0xfd   :  { %v1166_v13 = vpop.f32.mrb[4].mxu0  ;;  %1224 = vmatprep.mubr.bf16.mxu0 %v450_v12  ;;  %v1195_v43 = vpop.f32.mrb[2].mxu1 }
  0xfe   :  { %v240_v15 = vpop.f32.mrb[5].mxu0  ;;  %1225 = vmatmul.mubr.bf16.vlgmr.msra.gmra.mrb[16].mxu0 %v451_v11  ;;  %v440_v18 = vmul.f32 %v1166_v13, %v387_v16  ;;  %v644_v45 = vpop.f32.mrb[3].mxu1 }
  0xff   :  { %v1167_v17 = vpop.f32.mrb[6].mxu0  ;;  %v438_v21 = vmul.f32 %v377_v8, %v240_v15 }
 0x100   :  { %v441_v19 = vmul.f32 %v1167_v17, %v392_v14  ;;  %v243_v20 = vpop.f32.mrb[7].mxu0 }
 0x101   :  { %v439_v22 = vmul.f32 %v382_v4, %v243_v20 }
 0x102   :  { %v453_v23 = vpack.c.bf16 %v441_v19, %v440_v18 }
 0x103   :  { %v452_v24 = vpack.c.bf16 %v439_v22, %v438_v21  ;;  %v1198_v53 = vpop.f32.mrb[4].mxu1 }
 0x104   :  { %v657_v54 = vpop.f32.mrb[5].mxu1 }
 0x105   :  { %v1170_v26 = vpop.f32.mrb[8].mxu0  ;;  %1228 = vmatprep.mubr.bf16.mxu0 %v452_v24  ;;  %v1199_v55 = vpop.f32.mrb[6].mxu1 }
 0x106   :  { %v256_v28 = vpop.f32.mrb[9].mxu0  ;;  %1229 = vmatmul.mubr.bf16.gmra.mrb[20].mxu0 %v453_v23  ;;  %v444_v30 = vmul.f32 %v1170_v26, %v407_v0  ;;  %v660_v56 = vpop.f32.mrb[7].mxu1 }
 0x107   :  { %v1171_v29 = vpop.f32.mrb[10].mxu0  ;;  %v442_v33 = vmul.f32 %v397_v62, %v256_v28 }
 0x108   :  { %v445_v31 = vmul.f32 %v1171_v29, %v412_v63  ;;  %v259_v32 = vpop.f32.mrb[11].mxu0 }
 0x109   :  { %v443_v34 = vmul.f32 %v402_v61, %v259_v32 }
 0x10a   :  { %v455_v35 = vpack.c.bf16 %v445_v31, %v444_v30 }
 0x10b   :  { %v454_v37 = vpack.c.bf16 %v443_v34, %v442_v33 }
 0x10d   :  { %v1174_v40 = vpop.f32.mrb[12].mxu0  ;;  %1232 = vmatprep.mubr.bf16.mxu1 %v454_v37 }
 0x10e   :  { %v272_v42 = vpop.f32.mrb[13].mxu0  ;;  %1233 = vmatmul.mubr.bf16.vlgmr.msra.gmra.mrb[8].mxu1 %v455_v35  ;;  %v448_v46 = vmul.f32 %v1174_v40, %v427_v38 }
 0x10f   :  { %v1175_v44 = vpop.f32.mrb[14].mxu0  ;;  %v446_v49 = vmul.f32 %v417_v27, %v272_v42 }
 0x110   :  { %v449_v47 = vmul.f32 %v1175_v44, %v432_v36  ;;  %v275_v48 = vpop.f32.mrb[15].mxu0 }
 0x111   :  { %v447_v50 = vmul.f32 %v422_v25, %v275_v48 }
 0x112   :  { %v457_v51 = vpack.c.bf16 %v449_v47, %v448_v46 }
 0x113   :  { %v456_v52 = vpack.c.bf16 %v447_v50, %v446_v49 }
 0x115   :  { %1236 = vmatprep.mubr.bf16.mxu1 %v456_v52 }
 0x116   :  { %1237 = vmatmul.mubr.bf16.gmra.mrb[12].mxu1 %v457_v51 }
 0x1d1   :  { %v1226_v57 = vpop.f32.mrb[16].mxu0 }
 0x1d2   :  { %v795_v59 = vadd.f32 %v1226_v57, %v1194_v39  ;;  %v786_v60 = vpop.f32.mrb[17].mxu0 }
 0x1d3   :  { %v787_v61 = vadd.f32 %v786_v60, %v641_v41  ;;  %v1227_v62 = vpop.f32.mrb[18].mxu0 }
 0x1d4   :  { %v858_v63 = vadd.f32 %v1523_v58, %v795_v59  ;;  %v798_v0 = vadd.f32 %v1227_v62, %v1195_v43  ;;  %v789_v1 = vpop.f32.mrb[19].mxu0 }
 0x1d5   :  { %v856_v2 = vadd.f32 %v1523_v58, %v787_v61  ;;  %v790_v3 = vadd.f32 %v789_v1, %v644_v45 }
 0x1d6   :  { %v859_v4 = vadd.f32 %v1523_v58, %v798_v0  ;;  %v874_v6 = vmax.f32 %v858_v63, 0.0 }
 0x1d7   :  { %v857_v5 = vadd.f32 %v1523_v58, %v790_v3  ;;  %v872_v8 = vmax.f32 %v856_v2, 0.0 }
 0x1d8   :  { %v875_v7 = vmax.f32 %v859_v4, 0.0 }
 0x1d9   :  { %v873_v9 = vmax.f32 %v857_v5, 0.0  ;;  %v1230_v10 = vpop.f32.mrb[20].mxu0 }
 0x1da   :  { %v1057_v11 = vpack.c.bf16 %v875_v7, %v874_v6  ;;  %v811_v12 = vadd.f32 %v1230_v10, %v1198_v53  ;;  %v802_v13 = vpop.f32.mrb[21].mxu0 }
 0x1db   :  { %v1052_v14 = vpack.c.bf16 %v873_v9, %v872_v8  ;;  %v803_v15 = vadd.f32 %v802_v13, %v657_v54  ;;  %v1231_v16 = vpop.f32.mrb[22].mxu0 }
 0x1dc   :  { %1089 = vst [vmem:[%s1570_s5 + $0x8] sm:$0xff] %v1057_v11   ;;  %v862_v17 = vadd.f32 %v1523_v58, %v811_v12  ;;  %v814_v18 = vadd.f32 %v1231_v16, %v1199_v55  ;;  %v805_v19 = vpop.f32.mrb[23].mxu0 }
 0x1dd   :  { %1053 = vst [vmem:[%s1570_s5] sm:$0xff] %v1052_v14   ;;  %v860_v20 = vadd.f32 %v1523_v58, %v803_v15  ;;  %v806_v21 = vadd.f32 %v805_v19, %v660_v56 }
 0x1de   :  { %v863_v22 = vadd.f32 %v1523_v58, %v814_v18  ;;  %v878_v24 = vmax.f32 %v862_v17, 0.0 }
 0x1df   :  { %v861_v23 = vadd.f32 %v1523_v58, %v806_v21  ;;  %v876_v26 = vmax.f32 %v860_v20, 0.0 }
 0x1e0   :  { %v879_v25 = vmax.f32 %v863_v22, 0.0 }
 0x1e1   :  { %v877_v27 = vmax.f32 %v861_v23, 0.0  ;;  %v1234_v28 = vpop.f32.mrb[8].mxu1 }
 0x1e2   :  { %v1067_v29 = vpack.c.bf16 %v879_v25, %v878_v24  ;;  %v866_v30 = vadd.f32 %v1234_v28, %v1523_v58  ;;  %v818_v31 = vpop.f32.mrb[9].mxu1 }
 0x1e3   :  { %v1062_v32 = vpack.c.bf16 %v877_v27, %v876_v26  ;;  %v864_v33 = vadd.f32 %v1523_v58, %v818_v31  ;;  %v1235_v34 = vpop.f32.mrb[10].mxu1 }
 0x1e4   :  { %1091 = vst [vmem:[%s1570_s5 + $0x18] sm:$0xff] %v1067_v29   ;;  %v867_v35 = vadd.f32 %v1235_v34, %v1523_v58  ;;  %v821_v36 = vpop.f32.mrb[11].mxu1  ;;  %v882_v38 = vmax.f32 %v866_v30, 0.0 }
 0x1e5   :  { %1090 = vst [vmem:[%s1570_s5 + $0x10] sm:$0xff] %v1062_v32   ;;  %v865_v37 = vadd.f32 %v1523_v58, %v821_v36  ;;  %v880_v40 = vmax.f32 %v864_v33, 0.0 }
 0x1e6   :  { %v883_v39 = vmax.f32 %v867_v35, 0.0 }
 0x1e7   :  { %v881_v41 = vmax.f32 %v865_v37, 0.0 }
 0x1e8   :  { %v1077_v42 = vpack.c.bf16 %v883_v39, %v882_v38 }
 0x1e9   :  { %v1072_v43 = vpack.c.bf16 %v881_v41, %v880_v40  ;;  %v1238_v44 = vpop.f32.mrb[12].mxu1 }
 0x1ea   :  { %1093 = vst [vmem:[%s1570_s5 + $0x28] sm:$0xff] %v1077_v42   ;;  %v870_v45 = vadd.f32 %v1238_v44, %v1523_v58  ;;  %v834_v46 = vpop.f32.mrb[13].mxu1 }
 0x1eb   :  { %1092 = vst [vmem:[%s1570_s5 + $0x20] sm:$0xff] %v1072_v43   ;;  %v868_v47 = vadd.f32 %v1523_v58, %v834_v46  ;;  %v1239_v48 = vpop.f32.mrb[14].mxu1 }
 0x1ec   :  { %v871_v49 = vadd.f32 %v1239_v48, %v1523_v58  ;;  %v837_v50 = vpop.f32.mrb[15].mxu1  ;;  %v886_v52 = vmax.f32 %v870_v45, 0.0 }
 0x1ed   :  { %v869_v51 = vadd.f32 %v1523_v58, %v837_v50  ;;  %v884_v54 = vmax.f32 %v868_v47, 0.0 }
 0x1ee   :  { %v887_v53 = vmax.f32 %v871_v49, 0.0 }
 0x1ef   :  { %v885_v55 = vmax.f32 %v869_v51, 0.0 }
 0x1f0   :  { %v1087_v56 = vpack.c.bf16 %v887_v53, %v886_v52 }
 0x1f1   :  { %v1082_v57 = vpack.c.bf16 %v885_v55, %v884_v54 }
 0x1f2   :  { %1095 = vst [vmem:[%s1570_s5 + $0x38] sm:$0xff] %v1087_v56  }
 0x1f3   :  { %1094 = vst [vmem:[%s1570_s5 + $0x30] sm:$0xff] %v1082_v57  }

// kernel: graphsage_encoder.5
= control target key start
LH: loop header
LB: loop body
LE: loop exit
PB: predicated region body
PF: predicated region fallthrough
CT: control target
= control target key end

     0   :  { %v1172_v1 = vmov 0   ;;  %s1446_s1 = inlined_call_operand.vmem [shape: bf16[128,128], index: 1, kind: input, shape index: {}]   ;;  %s1447_s0 = inlined_call_operand.vmem [shape: bf16[128,128], index: 0, kind: input, shape index: {}]   ;;  %s1448_s2 = inlined_call_operand.vmem [shape: f32[128,1], index: 2, kind: input, shape index: {}]   ;;  %s1449_s3 = inlined_call_operand.vmem [shape: bf16[256,128], index: 3, kind: input, shape index: {}]   ;;  %s1450_s4 = inlined_call_operand.vmem [shape: f32[1,128], index: 4, kind: input, shape index: {}]   ;;  %s1451_s5 = inlined_call_operand.vmem [shape: f32[128,128], index: 5, kind: output, shape index: {}]  }
   0x1   :  { %v1132_v0 = vld [vmem:[%s1446_s1] sm:$0xff]   ;;  %1131 = vset.pattern.permute.xlu1 %v1172_v1  ;;  %1130 = vset.pattern.permute.xlu0 %v1172_v1  ;;  %v1133_v2 = vld [vmem:[%s1446_s1 + $0x8] sm:$0xff]   ;;  %v1134_v3 = vld [vmem:[%s1446_s1 + $0x10] sm:$0xff]  }
   0x2   :  { %1001 = vmatprep.subr.bf16.mxu0 %v1132_v0  ;;  %v1135_v4 = vld [vmem:[%s1446_s1 + $0x18] sm:$0xff]   ;;  %v1140_v5 = vld [vmem:[%s1447_s0] sm:$0xff]   ;;  %v1137_v7 = vld [vmem:[%s1446_s1 + $0x28] sm:$0xff]  }
   0x3   :  { %1002 = vmatpush3.bf16.msra.mxu0 %v1132_v0  ;;  %1017 = vmatprep.mubr.bf16.mxu0 %v1140_v5  ;;  %v1136_v6 = vld [vmem:[%s1446_s1 + $0x20] sm:$0xff]   ;;  %v340_v8 = vld [vmem:[%s1448_s2 + $0x10] sm:$0xff]  ;;  %v341_v10 = vld [vmem:[%s1448_s2 + $0x18] sm:$0xff] }
   0x4   :  { %1003 = vmatprep.subr.bf16.mxu0 %v1133_v2  ;;  %v338_v9 = vld [vmem:[%s1448_s2] sm:$0xff]  ;;  %366 = vperm.xlu1 %1131, %v340_v8   ;;  %v339_v11 = vld [vmem:[%s1448_s2 + $0x8] sm:$0xff]  ;;  %v1138_v12 = vld [vmem:[%s1446_s1 + $0x30] sm:$0xff]  }
   0x5   :  { %356 = vperm.xlu0 %1130, %v338_v9   ;;  %v347_v13 = vld [vmem:[%s1448_s2 + $0x48] sm:$0xff]  ;;  %v346_v14 = vld [vmem:[%s1448_s2 + $0x40] sm:$0xff]  ;;  %v1139_v17 = vld [vmem:[%s1446_s1 + $0x38] sm:$0xff]  }
   0x6   :  { %v1148_v15 = vld [vmem:[%s1449_s3 + $0x40] sm:$0xff]   ;;  %v1149_v16 = vld [vmem:[%s1449_s3 + $0x48] sm:$0xff]   ;;  %v349_v18 = vld [vmem:[%s1448_s2 + $0x58] sm:$0xff] }
   0x7   :  { %1004 = vmatpush3.bf16.msra.mxu0 %v1133_v2  ;;  %1033 = vmatprep.subr.bf16.mxu1 %v1148_v15  ;;  %v348_v19 = vld [vmem:[%s1448_s2 + $0x50] sm:$0xff]  ;;  %v1141_v21 = vld [vmem:[%s1447_s0 + $0x8] sm:$0xff]   ;;  %v1269_v22 = vld [vmem:[%s1449_s3] sm:$0xff]  }
   0x8   :  { %1005 = vmatprep.subr.bf16.mxu0 %v1134_v3  ;;  %371 = vperm.xlu1 %1131, %v341_v10   ;;  %v1150_v20 = vld [vmem:[%s1449_s3 + $0x50] sm:$0xff]   ;;  %v343_v24 = vld [vmem:[%s1448_s2 + $0x28] sm:$0xff]  ;;  %v342_v25 = vld [vmem:[%s1448_s2 + $0x20] sm:$0xff] }
   0x9   :  { %361 = vperm.xlu0 %1130, %v339_v11   ;;  %1034 = vmatpush3.bf16.msra.mxu1 %v1148_v15  ;;  %v1142_v23 = vld [vmem:[%s1447_s0 + $0x10] sm:$0xff]   ;;  %v1151_v26 = vld [vmem:[%s1449_s3 + $0x58] sm:$0xff]   ;;  %v1159_v29 = vld [vmem:[%s1446_s1] sm:$0xff]  }
   0xa   :  { %1035 = vmatprep.subr.bf16.mxu1 %v1149_v16  ;;  %v345_v27 = vld [vmem:[%s1448_s2 + $0x38] sm:$0xff]  ;;  %v344_v28 = vld [vmem:[%s1448_s2 + $0x30] sm:$0xff]  ;;  %v1155_v30 = vld [vmem:[%s1449_s3 + $0x8] sm:$0xff]   ;;  %1049 = vmatprep.mubr.bf16.mxu1 %v1159_v29 }
   0xb   :  { %1006 = vmatpush3.bf16.msra.mxu0 %v1134_v3  ;;  %v1152_v31 = vld [vmem:[%s1449_s3 + $0x60] sm:$0xff]   ;;  %v1143_v32 = vld [vmem:[%s1447_s0 + $0x18] sm:$0xff]   ;;  %v351_v33 = vld [vmem:[%s1448_s2 + $0x68] sm:$0xff] }
   0xc   :  { %1007 = vmatprep.subr.bf16.mxu0 %v1135_v4  ;;  %401 = vperm.xlu1 %1131, %v347_v13   ;;  %v350_v34 = vld [vmem:[%s1448_s2 + $0x60] sm:$0xff]  ;;  %v1154_v36 = vld [vmem:[%s1449_s3 + $0x68] sm:$0xff]   ;;  %v353_v37 = vld [vmem:[%s1448_s2 + $0x78] sm:$0xff] }
   0xd   :  { %396 = vperm.xlu0 %1130, %v346_v14   ;;  %1036 = vmatpush3.bf16.msra.mxu1 %v1149_v16  ;;  %v1144_v35 = vld [vmem:[%s1447_s0 + $0x20] sm:$0xff]   ;;  %v352_v38 = vld [vmem:[%s1448_s2 + $0x70] sm:$0xff]  ;;  %v1160_v41 = vld [vmem:[%s1449_s3 + $0x18] sm:$0xff]  }
   0xe   :  { %1037 = vmatprep.subr.bf16.mxu1 %v1150_v20  ;;  %v1157_v39 = vld [vmem:[%s1449_s3 + $0x10] sm:$0xff]   ;;  %v1145_v42 = vld [vmem:[%s1447_s0 + $0x28] sm:$0xff]   ;;  %v1158_v44 = vld [vmem:[%s1449_s3 + $0x78] sm:$0xff]  }
   0xf   :  { %1008 = vmatpush3.bf16.msra.mxu0 %v1135_v4  ;;  %v1156_v40 = vld [vmem:[%s1449_s3 + $0x70] sm:$0xff]   ;;  %v1162_v45 = vld [vmem:[%s1449_s3 + $0x20] sm:$0xff]   ;;  %v1161_v46 = vld [vmem:[%s1446_s1 + $0x8] sm:$0xff]  }
  0x10   :  { %1009 = vmatprep.subr.bf16.mxu0 %v1136_v6  ;;  %411 = vperm.xlu1 %1131, %v349_v18   ;;  %v1146_v43 = vld [vmem:[%s1447_s0 + $0x30] sm:$0xff]   ;;  %v1164_v47 = vld [vmem:[%s1449_s3 + $0x28] sm:$0xff]   ;;  %v1147_v48 = vld [vmem:[%s1447_s0 + $0x38] sm:$0xff]  }
  0x11   :  { %406 = vperm.xlu0 %1130, %v348_v19   ;;  %1038 = vmatpush3.bf16.msra.mxu1 %v1150_v20  ;;  %v1163_v49 = vld [vmem:[%s1446_s1 + $0x10] sm:$0xff]   ;;  %v1165_v50 = vld [vmem:[%s1446_s1 + $0x18] sm:$0xff]   ;;  %v1168_v53 = vld [vmem:[%s1446_s1 + $0x20] sm:$0xff]  }
  0x12   :  { %1039 = vmatprep.subr.bf16.mxu1 %v1151_v26  ;;  %v1166_v51 = vld [vmem:[%s1449_s3 + $0x30] sm:$0xff]   ;;  %v1167_v52 = vld [vmem:[%s1449_s3 + $0x38] sm:$0xff]   ;;  %v1169_v54 = vld [vmem:[%s1446_s1 + $0x28] sm:$0xff]  }
  0x13   :  { %1010 = vmatpush3.bf16.msra.mxu0 %v1136_v6  ;;  %v1170_v55 = vld [vmem:[%s1446_s1 + $0x30] sm:$0xff]   ;;  %v1171_v56 = vld [vmem:[%s1446_s1 + $0x38] sm:$0xff]  }
  0x14   :  { %1011 = vmatprep.subr.bf16.mxu0 %v1137_v7  ;;  %381 = vperm.xlu1 %1131, %v343_v24  }
  0x15   :  { %376 = vperm.xlu0 %1130, %v342_v25   ;;  %1040 = vmatpush3.bf16.msra.mxu1 %v1151_v26 }
  0x16   :  { %1041 = vmatprep.subr.bf16.mxu1 %v1152_v31 }
  0x17   :  { %1012 = vmatpush3.bf16.msra.mxu0 %v1137_v7 }
  0x18   :  { %1013 = vmatprep.subr.bf16.mxu0 %v1138_v12  ;;  %391 = vperm.xlu1 %1131, %v345_v27  }
  0x19   :  { %386 = vperm.xlu0 %1130, %v344_v28   ;;  %1042 = vmatpush3.bf16.msra.mxu1 %v1152_v31 }
  0x1a   :  { %1043 = vmatprep.subr.bf16.mxu1 %v1154_v36 }
  0x1b   :  { %1014 = vmatpush3.bf16.msra.mxu0 %v1138_v12 }
  0x1c   :  { %1015 = vmatprep.subr.bf16.mxu0 %v1139_v17  ;;  %421 = vperm.xlu1 %1131, %v351_v33  }
  0x1d   :  { %416 = vperm.xlu0 %1130, %v350_v34   ;;  %1044 = vmatpush3.bf16.msra.mxu1 %v1154_v36 }
  0x1e   :  { %1045 = vmatprep.subr.bf16.mxu1 %v1156_v40 }
  0x1f   :  { %1016 = vmatpush3.bf16.msra.mxu0 %v1139_v17 }
  0x20   :  { %1065 = vmatprep.subr.bf16.mxu0 %v1269_v22  ;;  %431 = vperm.xlu1 %1131, %v353_v37  }
  0x21   :  { %426 = vperm.xlu0 %1130, %v352_v38   ;;  %1046 = vmatpush3.bf16.msra.mxu1 %v1156_v40 }
  0x22   :  { %1018 = vmatmul.mubr.bf16.vlgmr.msra.gmra.mrb[0].mxu0 %v1141_v21  ;;  %1047 = vmatprep.subr.bf16.mxu1 %v1158_v44 }
  0x23   :  { %1021 = vmatprep.mubr.bf16.mxu0 %v1142_v23  ;;  %1066 = vmatpush3.bf16.msra.mxu0 %v1269_v22 }
  0x24   :  { %1067 = vmatprep.subr.bf16.mxu0 %v1155_v30 }
  0x25   :  { %1048 = vmatpush3.bf16.msra.mxu1 %v1158_v44 }
  0x26   :  { %1097 = vmatprep.subr.bf16.mxu1 %v1269_v22 }
  0x27   :  { %1068 = vmatpush3.bf16.msra.mxu0 %v1155_v30 }
  0x28   :  { %1069 = vmatprep.subr.bf16.mxu0 %v1157_v39  ;;  %1050 = vmatmul.mubr.bf16.vlgmr.msra.gmra.mrb[0].mxu1 %v1161_v46 }
  0x29   :  { %1105 = vmatpush3.bf16.msra.mxu1 %v1269_v22  ;;  %1053 = vmatprep.mubr.bf16.mxu1 %v1163_v49 }
  0x2a   :  { %1022 = vmatmul.mubr.bf16.gmra.mrb[4].mxu0 %v1143_v32  ;;  %1098 = vmatprep.subr.bf16.mxu1 %v1155_v30 }
  0x2b   :  { %1025 = vmatprep.mubr.bf16.mxu0 %v1144_v35  ;;  %1070 = vmatpush3.bf16.msra.mxu0 %v1157_v39 }
  0x2c   :  { %1071 = vmatprep.subr.bf16.mxu0 %v1160_v41 }
  0x2d   :  { %1106 = vmatpush3.bf16.msra.mxu1 %v1155_v30 }
  0x2e   :  { %1099 = vmatprep.subr.bf16.mxu1 %v1157_v39 }
  0x2f   :  { %1072 = vmatpush3.bf16.msra.mxu0 %v1160_v41 }
  0x30   :  { %1073 = vmatprep.subr.bf16.mxu0 %v1162_v45  ;;  %1054 = vmatmul.mubr.bf16.gmra.mrb[4].mxu1 %v1165_v50 }
  0x31   :  { %1107 = vmatpush3.bf16.msra.mxu1 %v1157_v39  ;;  %1057 = vmatprep.mubr.bf16.mxu1 %v1168_v53 }
  0x32   :  { %1026 = vmatmul.mubr.bf16.gmra.mrb[8].mxu0 %v1145_v42  ;;  %1100 = vmatprep.subr.bf16.mxu1 %v1160_v41 }
  0x33   :  { %1029 = vmatprep.mubr.bf16.mxu0 %v1146_v43  ;;  %1074 = vmatpush3.bf16.msra.mxu0 %v1162_v45 }
  0x34   :  { %1075 = vmatprep.subr.bf16.mxu0 %v1164_v47 }
  0x35   :  { %1108 = vmatpush3.bf16.msra.mxu1 %v1160_v41 }
  0x36   :  { %1101 = vmatprep.subr.bf16.mxu1 %v1162_v45 }
  0x37   :  { %1076 = vmatpush3.bf16.msra.mxu0 %v1164_v47 }
  0x38   :  { %1077 = vmatprep.subr.bf16.mxu0 %v1166_v51  ;;  %1058 = vmatmul.mubr.bf16.gmra.mrb[8].mxu1 %v1169_v54 }
  0x39   :  { %1109 = vmatpush3.bf16.msra.mxu1 %v1162_v45  ;;  %1061 = vmatprep.mubr.bf16.mxu1 %v1170_v55 }
  0x3a   :  { %1030 = vmatmul.mubr.bf16.gmra.mrb[12].mxu0 %v1147_v48  ;;  %1102 = vmatprep.subr.bf16.mxu1 %v1164_v47 }
  0x3b   :  { %1078 = vmatpush3.bf16.msra.mxu0 %v1166_v51 }
  0x3c   :  { %1079 = vmatprep.subr.bf16.mxu0 %v1167_v52 }
  0x3d   :  { %1110 = vmatpush3.bf16.msra.mxu1 %v1164_v47 }
  0x3e   :  { %1103 = vmatprep.subr.bf16.mxu1 %v1166_v51 }
  0x3f   :  { %1080 = vmatpush3.bf16.msra.mxu0 %v1167_v52 }
  0x40   :  { %1062 = vmatmul.mubr.bf16.gmra.mrb[12].mxu1 %v1171_v56 }
  0x41   :  { %1111 = vmatpush3.bf16.msra.mxu1 %v1166_v51 }
  0x42   :  { %1104 = vmatprep.subr.bf16.mxu1 %v1167_v52 }
  0x45   :  { %1112 = vmatpush3.bf16.msra.mxu1 %v1167_v52 }
  0x83   :  { %v367_v57 = vpop.permute.xlu1 %366 }
  0x84   :  { %v357_v58 = vpop.permute.xlu0 %356 }
  0x87   :  { %v372_v59 = vpop.permute.xlu1 %371 }
  0x88   :  { %v362_v60 = vpop.permute.xlu0 %361 }
  0x8b   :  { %v402_v61 = vpop.permute.xlu1 %401 }
  0x8c   :  { %v397_v62 = vpop.permute.xlu0 %396 }
  0x8f   :  { %v412_v63 = vpop.permute.xlu1 %411 }
  0x90   :  { %v407_v0 = vpop.permute.xlu0 %406 }
  0x93   :  { %v382_v4 = vpop.permute.xlu1 %381 }
  0x94   :  { %v377_v8 = vpop.permute.xlu0 %376 }
  0x97   :  { %v392_v14 = vpop.permute.xlu1 %391 }
  0x98   :  { %v387_v16 = vpop.permute.xlu0 %386 }
  0x9b   :  { %v422_v25 = vpop.permute.xlu1 %421 }
  0x9c   :  { %v417_v27 = vpop.permute.xlu0 %416 }
  0x9f   :  { %v432_v36 = vpop.permute.xlu1 %431 }
  0xa0   :  { %v427_v38 = vpop.permute.xlu0 %426 }
  0xf5   :  { %v1019_v1 = vpop.f32.mrb[0].mxu0 }
  0xf6   :  { %v224_v2 = vpop.f32.mrb[1].mxu0  ;;  %v436_v5 = vmul.f32 %v1019_v1, %v367_v57 }
  0xf7   :  { %v1020_v3 = vpop.f32.mrb[2].mxu0  ;;  %v434_v9 = vmul.f32 %v357_v58, %v224_v2  ;;  %v1380_v58 = vld [vmem:[%s1450_s4] ss:$0 sm:$0xff] }
  0xf8   :  { %v437_v6 = vmul.f32 %v1020_v3, %v372_v59  ;;  %v227_v7 = vpop.f32.mrb[3].mxu0 }
  0xf9   :  { %v435_v10 = vmul.f32 %v362_v60, %v227_v7 }
  0xfa   :  { %v451_v11 = vpack.c.bf16 %v437_v6, %v436_v5 }
  0xfb   :  { %v450_v12 = vpack.c.bf16 %v435_v10, %v434_v9  ;;  %v1051_v39 = vpop.f32.mrb[0].mxu1 }
  0xfc   :  { %v641_v41 = vpop.f32.mrb[1].mxu1 }
  0xfd   :  { %v1023_v13 = vpop.f32.mrb[4].mxu0  ;;  %1081 = vmatprep.mubr.bf16.mxu0 %v450_v12  ;;  %v1052_v43 = vpop.f32.mrb[2].mxu1 }
  0xfe   :  { %v240_v15 = vpop.f32.mrb[5].mxu0  ;;  %1082 = vmatmul.mubr.bf16.vlgmr.msra.gmra.mrb[16].mxu0 %v451_v11  ;;  %v440_v18 = vmul.f32 %v1023_v13, %v387_v16  ;;  %v644_v45 = vpop.f32.mrb[3].mxu1 }
  0xff   :  { %v1024_v17 = vpop.f32.mrb[6].mxu0  ;;  %v438_v21 = vmul.f32 %v377_v8, %v240_v15 }
 0x100   :  { %v441_v19 = vmul.f32 %v1024_v17, %v392_v14  ;;  %v243_v20 = vpop.f32.mrb[7].mxu0 }
 0x101   :  { %v439_v22 = vmul.f32 %v382_v4, %v243_v20 }
 0x102   :  { %v453_v23 = vpack.c.bf16 %v441_v19, %v440_v18 }
 0x103   :  { %v452_v24 = vpack.c.bf16 %v439_v22, %v438_v21  ;;  %v1055_v53 = vpop.f32.mrb[4].mxu1 }
 0x104   :  { %v657_v54 = vpop.f32.mrb[5].mxu1 }
 0x105   :  { %v1027_v26 = vpop.f32.mrb[8].mxu0  ;;  %1085 = vmatprep.mubr.bf16.mxu0 %v452_v24  ;;  %v1056_v55 = vpop.f32.mrb[6].mxu1 }
 0x106   :  { %v256_v28 = vpop.f32.mrb[9].mxu0  ;;  %1086 = vmatmul.mubr.bf16.gmra.mrb[20].mxu0 %v453_v23  ;;  %v444_v30 = vmul.f32 %v1027_v26, %v407_v0  ;;  %v660_v56 = vpop.f32.mrb[7].mxu1 }
 0x107   :  { %v1028_v29 = vpop.f32.mrb[10].mxu0  ;;  %v442_v33 = vmul.f32 %v397_v62, %v256_v28 }
 0x108   :  { %v445_v31 = vmul.f32 %v1028_v29, %v412_v63  ;;  %v259_v32 = vpop.f32.mrb[11].mxu0 }
 0x109   :  { %v443_v34 = vmul.f32 %v402_v61, %v259_v32 }
 0x10a   :  { %v455_v35 = vpack.c.bf16 %v445_v31, %v444_v30 }
 0x10b   :  { %v454_v37 = vpack.c.bf16 %v443_v34, %v442_v33 }
 0x10d   :  { %v1031_v40 = vpop.f32.mrb[12].mxu0  ;;  %1089 = vmatprep.mubr.bf16.mxu1 %v454_v37 }
 0x10e   :  { %v272_v42 = vpop.f32.mrb[13].mxu0  ;;  %1090 = vmatmul.mubr.bf16.vlgmr.msra.gmra.mrb[8].mxu1 %v455_v35  ;;  %v448_v46 = vmul.f32 %v1031_v40, %v427_v38 }
 0x10f   :  { %v1032_v44 = vpop.f32.mrb[14].mxu0  ;;  %v446_v49 = vmul.f32 %v417_v27, %v272_v42 }
 0x110   :  { %v449_v47 = vmul.f32 %v1032_v44, %v432_v36  ;;  %v275_v48 = vpop.f32.mrb[15].mxu0 }
 0x111   :  { %v447_v50 = vmul.f32 %v422_v25, %v275_v48 }
 0x112   :  { %v457_v51 = vpack.c.bf16 %v449_v47, %v448_v46 }
 0x113   :  { %v456_v52 = vpack.c.bf16 %v447_v50, %v446_v49 }
 0x115   :  { %1093 = vmatprep.mubr.bf16.mxu1 %v456_v52 }
 0x116   :  { %1094 = vmatmul.mubr.bf16.gmra.mrb[12].mxu1 %v457_v51 }
 0x1d1   :  { %v1083_v57 = vpop.f32.mrb[16].mxu0 }
 0x1d2   :  { %v795_v59 = vadd.f32 %v1083_v57, %v1051_v39  ;;  %v786_v60 = vpop.f32.mrb[17].mxu0 }
 0x1d3   :  { %v787_v61 = vadd.f32 %v786_v60, %v641_v41  ;;  %v1084_v62 = vpop.f32.mrb[18].mxu0 }
 0x1d4   :  { %v858_v63 = vadd.f32 %v1380_v58, %v795_v59  ;;  %v798_v0 = vadd.f32 %v1084_v62, %v1052_v43  ;;  %v789_v1 = vpop.f32.mrb[19].mxu0 }
 0x1d5   :  { %v856_v2 = vadd.f32 %v1380_v58, %v787_v61  ;;  %v790_v3 = vadd.f32 %v789_v1, %v644_v45 }
 0x1d6   :  { %v874_v4 = vmax.f32 %v858_v63, 0.0  ;;  %v859_v5 = vadd.f32 %v1380_v58, %v798_v0 }
 0x1d7   :  { %v872_v6 = vmax.f32 %v856_v2, 0.0  ;;  %v857_v7 = vadd.f32 %v1380_v58, %v790_v3 }
 0x1d8   :  { %890 = vst [vmem:[%s1451_s5 + $0x10] sm:$0xff] %v874_v4  ;;  %v875_v8 = vmax.f32 %v859_v5, 0.0 }
 0x1d9   :  { %888 = vst [vmem:[%s1451_s5] sm:$0xff] %v872_v6  ;;  %v873_v9 = vmax.f32 %v857_v7, 0.0  ;;  %v1087_v10 = vpop.f32.mrb[20].mxu0 }
 0x1da   :  { %891 = vst [vmem:[%s1451_s5 + $0x18] sm:$0xff] %v875_v8  ;;  %v811_v11 = vadd.f32 %v1087_v10, %v1055_v53  ;;  %v802_v12 = vpop.f32.mrb[21].mxu0 }
 0x1db   :  { %889 = vst [vmem:[%s1451_s5 + $0x8] sm:$0xff] %v873_v9  ;;  %v803_v13 = vadd.f32 %v802_v12, %v657_v54  ;;  %v1088_v14 = vpop.f32.mrb[22].mxu0 }
 0x1dc   :  { %v862_v15 = vadd.f32 %v1380_v58, %v811_v11  ;;  %v814_v16 = vadd.f32 %v1088_v14, %v1056_v55  ;;  %v805_v17 = vpop.f32.mrb[23].mxu0 }
 0x1dd   :  { %v860_v18 = vadd.f32 %v1380_v58, %v803_v13  ;;  %v806_v19 = vadd.f32 %v805_v17, %v660_v56 }
 0x1de   :  { %v878_v20 = vmax.f32 %v862_v15, 0.0  ;;  %v863_v21 = vadd.f32 %v1380_v58, %v814_v16 }
 0x1df   :  { %v876_v22 = vmax.f32 %v860_v18, 0.0  ;;  %v861_v23 = vadd.f32 %v1380_v58, %v806_v19 }
 0x1e0   :  { %894 = vst [vmem:[%s1451_s5 + $0x30] sm:$0xff] %v878_v20  ;;  %v879_v24 = vmax.f32 %v863_v21, 0.0 }
 0x1e1   :  { %892 = vst [vmem:[%s1451_s5 + $0x20] sm:$0xff] %v876_v22  ;;  %v877_v25 = vmax.f32 %v861_v23, 0.0  ;;  %v1091_v26 = vpop.f32.mrb[8].mxu1 }
 0x1e2   :  { %895 = vst [vmem:[%s1451_s5 + $0x38] sm:$0xff] %v879_v24  ;;  %v866_v27 = vadd.f32 %v1091_v26, %v1380_v58  ;;  %v818_v28 = vpop.f32.mrb[9].mxu1 }
 0x1e3   :  { %893 = vst [vmem:[%s1451_s5 + $0x28] sm:$0xff] %v877_v25  ;;  %v864_v29 = vadd.f32 %v1380_v58, %v818_v28  ;;  %v1092_v30 = vpop.f32.mrb[10].mxu1 }
 0x1e4   :  { %v882_v31 = vmax.f32 %v866_v27, 0.0  ;;  %v867_v32 = vadd.f32 %v1092_v30, %v1380_v58  ;;  %v821_v33 = vpop.f32.mrb[11].mxu1 }
 0x1e5   :  { %v880_v34 = vmax.f32 %v864_v29, 0.0  ;;  %v865_v35 = vadd.f32 %v1380_v58, %v821_v33 }
 0x1e6   :  { %898 = vst [vmem:[%s1451_s5 + $0x50] sm:$0xff] %v882_v31  ;;  %v883_v36 = vmax.f32 %v867_v32, 0.0 }
 0x1e7   :  { %896 = vst [vmem:[%s1451_s5 + $0x40] sm:$0xff] %v880_v34  ;;  %v881_v37 = vmax.f32 %v865_v35, 0.0 }
 0x1e8   :  { %899 = vst [vmem:[%s1451_s5 + $0x58] sm:$0xff] %v883_v36 }
 0x1e9   :  { %897 = vst [vmem:[%s1451_s5 + $0x48] sm:$0xff] %v881_v37  ;;  %v1095_v38 = vpop.f32.mrb[12].mxu1 }
 0x1ea   :  { %v870_v39 = vadd.f32 %v1095_v38, %v1380_v58  ;;  %v834_v40 = vpop.f32.mrb[13].mxu1 }
 0x1eb   :  { %v868_v41 = vadd.f32 %v1380_v58, %v834_v40  ;;  %v1096_v42 = vpop.f32.mrb[14].mxu1 }
 0x1ec   :  { %v886_v43 = vmax.f32 %v870_v39, 0.0  ;;  %v871_v44 = vadd.f32 %v1096_v42, %v1380_v58  ;;  %v837_v45 = vpop.f32.mrb[15].mxu1 }
 0x1ed   :  { %v884_v46 = vmax.f32 %v868_v41, 0.0  ;;  %v869_v47 = vadd.f32 %v1380_v58, %v837_v45 }
 0x1ee   :  { %902 = vst [vmem:[%s1451_s5 + $0x70] sm:$0xff] %v886_v43  ;;  %v887_v48 = vmax.f32 %v871_v44, 0.0 }
 0x1ef   :  { %900 = vst [vmem:[%s1451_s5 + $0x60] sm:$0xff] %v884_v46  ;;  %v885_v49 = vmax.f32 %v869_v47, 0.0 }
 0x1f0   :  { %903 = vst [vmem:[%s1451_s5 + $0x78] sm:$0xff] %v887_v48 }
 0x1f1   :  { %901 = vst [vmem:[%s1451_s5 + $0x68] sm:$0xff] %v885_v49 }

</bundles_post_ra>
